<compile_context>
chip_gen: v5e
topology: v5e:2x2
jax: 0.10.0
libtpu: 0.0.40
codegen_flags: <defaults>
</compile_context>

<pallas_src>
import jax
import jax.numpy as jnp
from jax.experimental import pallas as pl
from jax.experimental.pallas import tpu as pltpu


def _round_up(v, m):
    return ((v + m - 1) // m) * m


def _device_vmem_cap_bytes():
    """Physical VMEM per TensorCore (64 MiB on v7x, 128 MiB on v5e/v6e)."""
    try:
        return int(pltpu.get_tpu_info().vmem_capacity_bytes)
    except Exception:
        return 64 * 1024 * 1024  # conservative fallback (safe on all generations)


def _pick_tile_b(B, target=256):
    """Grid-aware batch tile: >= 2 grid steps when B allows, tight padding, %8."""
    if B <= 8:
        return B  # single exactly-fitting block (block dims == full array dims)
    n_steps = max(2, pl.cdiv(B, target))
    return min(_round_up(pl.cdiv(B, n_steps), 8), _round_up(B, 8))


def _qp_eq_kernel(x_ref, w_ref, c_ref, o_ref):
    """One batch tile of the fused QP solve: y = x @ W + c.

    x_ref: (tile_b, nx) f32    flattened puzzles tile (sign folded into W/c)
    w_ref: (nx, nx)     bf16   (I - A^T (A A^T)^{-1} A) / Qpenalty, VMEM-resident
    c_ref: (1, nx)      f32    A^T (A A^T)^{-1} b, VMEM-resident
    o_ref: (tile_b, nx) f32    solution tile
    """
    # Cast x to the weight dtype (bf16 -> native MXU rate; no-op for f32 weights).
    # The cast and the bias add are VPU filler under the MXU / DMA critical path.
    x = x_ref[...].astype(w_ref.dtype)
    o_ref[...] = (
        jnp.dot(x, w_ref[...], preferred_element_type=jnp.float32) + c_ref[...]
    )


def make_dqpeq_params(A, log_z0, Qpenalty, dtype=jnp.bfloat16):
    """Batch-independent setup (compute once, reuse across forward calls).

    Returns (W, c): W is (nx, nx) in `dtype` (bf16 MXU operand by default),
    c is (1, nx) float32 (added after the f32 accumulation).
    """
    A32 = A.astype(jnp.float32)
    m, nx = A32.shape
    b = A32 @ jnp.exp(log_z0.astype(jnp.float32))                 # (m,)
    cho = jax.scipy.linalg.cho_factor(A32 @ A32.T)                # (A A^T) factor
    MA = jax.scipy.linalg.cho_solve(cho, A32)                     # (m, nx) = M A
    Mb = jax.scipy.linalg.cho_solve(cho, b[:, None])[:, 0]        # (m,)    = M b
    inv_lam = 1.0 / float(Qpenalty)
    W = (jnp.eye(nx, dtype=jnp.float32) - A32.T @ MA) * inv_lam   # (nx, nx)
    c = (A32.T @ Mb).astype(jnp.float32).reshape(1, nx)           # (1, nx)
    return W.astype(dtype), c


def dqpeq_forward(puzzles, W, c, *, tile_b=None):
    """JAX/Pallas equivalent of dQPEq.forward (equality-constrained KKT part)."""
    B = puzzles.shape[0]
    nx = W.shape[0]
    # reshape/astype are metadata-only here (puzzles already f32): no extra HBM pass.
    x = puzzles.reshape(B, nx).astype(jnp.float32)

    if tile_b is None:
        tile_b = _pick_tile_b(B)
    grid = (pl.cdiv(B, tile_b),)   # ragged last tile handled by Pallas (no jnp.pad)

    # ---- VMEM budget: resident W + double-buffered x / y tiles ----
    w_bytes = W.size * W.dtype.itemsize
    est = (
        2 * w_bytes                    # W (worst case: double-buffered fallback)
        + 2 * 2 * tile_b * nx * 4      # x and y tiles, double-buffered, f32
        + 2 * c.size * 4               # bias
        + (2 << 20)                    # compiler scratch slack
    )
    cap = _device_vmem_cap_bytes() - (12 << 20)          # leave headroom (v7x: 64 MiB)
    vmem_limit = int(max(16 << 20, min(cap, max(32 << 20, 2 * est))))

    x_spec = pl.BlockSpec((tile_b, nx), lambda i: (i, 0))    # streamed batch tile
    o_spec = pl.BlockSpec((tile_b, nx), lambda i: (i, 0))
    out_shape = jax.ShapeDtypeStruct((B, nx), jnp.float32)   # no padding, no slice

    def run(single_buffer_resident):
        kw = dict(pipeline_mode=pl.Buffered(1)) if single_buffer_resident else {}
        w_spec = pl.BlockSpec((nx, nx), lambda i: (0, 0), **kw)  # VMEM-resident
        c_spec = pl.BlockSpec((1, nx), lambda i: (0, 0), **kw)   # VMEM-resident
        return pl.pallas_call(
            _qp_eq_kernel,
            out_shape=out_shape,
            grid=grid,
            in_specs=[x_spec, w_spec, c_spec],
            out_specs=o_spec,
            compiler_params=pltpu.CompilerParams(
                dimension_semantics=("parallel",),   # batch axis -> both TCs on v7x
                vmem_limit_bytes=vmem_limit,
            ),
        )(x, W, c)

    try:
        # Resident W / c single-buffered (their index_map is constant): saves the
        # dead second VMEM buffer.
        y = run(True)
    except Exception:
        # Fallback if this Pallas build rejects pipeline_mode=pl.Buffered(1).
        y = run(False)

    # torch: y = torch.squeeze(y).float().view_as(puzzles)
    return y.reshape(puzzles.shape)


def _reference_forward(puzzles, A, log_z0, Qpenalty):
    """Pure-JAX f32 reference of the original (unfolded) equality-constrained KKT solve."""
    B = puzzles.shape[0]
    m, nx = A.shape
    A32 = A.astype(jnp.float32)
    p = -puzzles.reshape(B, nx).astype(jnp.float32)
    b = A32 @ jnp.exp(log_z0.astype(jnp.float32))
    cho = jax.scipy.linalg.cho_factor(A32 @ A32.T)
    rhs = -(p @ A32.T) - Qpenalty * b[None, :]                    # (B, m)
    nu = jax.scipy.linalg.cho_solve(cho, rhs.T).T                 # (B, m)
    y = -(p + nu @ A32) / Qpenalty                                # (B, nx)
    return y.reshape(puzzles.shape).astype(jnp.float32)


if __name__ == "__main__":
    # Small sudoku instance: n = 2  ->  board S = n**2 = 4, nx = n**6 = 64.
    n = 2
    S = n ** 2
    nx = S ** 3                     # 64
    m = 40                          # synthetic stand-in for get_sudoku_matrix(n) rank
    B = 2
    Qpenalty = 0.1

    key = jax.random.PRNGKey(0)
    k_puz, k_A = jax.random.split(key)

    # Deterministic parameter init (matches __init__ with trueInit=False semantics):
    #   A = torch.rand(t.shape)  ->  uniform [0,1);  log_z0 = zeros
    A = jax.random.uniform(k_A, (m, nx), dtype=jnp.float32)
    log_z0 = jnp.zeros((nx,), dtype=jnp.float32)
    puzzles = jax.random.uniform(k_puz, (B, S, S, S), dtype=jnp.float32)

    # Batch-independent setup computed once (hoisted / cacheable across calls).
    W16, cbias = make_dqpeq_params(A, log_z0, Qpenalty)
    W16, cbias = jax.block_until_ready((W16, cbias))

    y = dqpeq_forward(puzzles, W16, cbias)
    y = jax.block_until_ready(y)

    assert y.shape == puzzles.shape and y.dtype == jnp.float32

    # (a) Kernel mechanics: must match a plain-JAX bf16-operand / f32-accumulation
    #     matmul of the same folded system essentially exactly.
    x16 = puzzles.reshape(B, nx).astype(jnp.bfloat16)
    y_bf16_ref = (
        jnp.dot(x16, W16, preferred_element_type=jnp.float32) + cbias
    ).reshape(puzzles.shape)
    assert jnp.allclose(y, y_bf16_ref, rtol=1e-4, atol=1e-4), "kernel vs bf16 math ref"

    # (b) Semantics: matches the full-f32 KKT solve to within bf16 operand precision
    #     (relative L2 error; bf16 quantization of W ~ 1/Qpenalty introduces ~1e-2).
    y_ref = _reference_forward(puzzles, A, log_z0, Qpenalty)
    rel_err = jnp.linalg.norm(y - y_ref) / jnp.linalg.norm(y_ref)
    assert float(rel_err) < 2e-2, f"kernel vs f32 KKT reference, rel_err={rel_err}"

    print("KERNEL_OK")
</pallas_src>

<mosaic_0001>
module attributes {stable_mosaic.version = 11 : i64} {
  func.func @_qp_eq_kernel(%arg0: i32, %arg1: memref<2x64xf32, #tpu.memory_space<vmem>>, %arg2: memref<64x64xbf16, #tpu.memory_space<vmem>>, %arg3: memref<1x64xf32, #tpu.memory_space<vmem>>, %arg4: memref<2x64xf32, #tpu.memory_space<vmem>>) attributes {dimension_semantics = [#tpu.dimension_semantics<parallel>], iteration_bounds = array<i64: 1>, scalar_prefetch = 0 : i64, scratch_operands = 0 : i64, tpu.core_type = #tpu.core_type<tc>, window_params = [{transform_indices = @transform_0, window_bounds = array<i64: 2, 64>}, {pipeline_mode = #tpu.pipeline_mode<synchronous>, transform_indices = @transform_1, window_bounds = array<i64: 64, 64>}, {pipeline_mode = #tpu.pipeline_mode<synchronous>, transform_indices = @transform_2, window_bounds = array<i64: 1, 64>}, {transform_indices = @transform_3, window_bounds = array<i64: 2, 64>}]} {
    %c0 = arith.constant 0 : index
    %c0_0 = arith.constant 0 : index
    %0 = vector.load %arg1[%c0, %c0_0] : memref<2x64xf32, #tpu.memory_space<vmem>>, vector<2x64xf32>
    %1 = arith.truncf %0 : vector<2x64xf32> to vector<2x64xbf16>
    %c0_1 = arith.constant 0 : index
    %c0_2 = arith.constant 0 : index
    %2 = vector.load %arg2[%c0_1, %c0_2] : memref<64x64xbf16, #tpu.memory_space<vmem>>, vector<64x64xbf16>
    %cst = arith.constant dense<0.000000e+00> : vector<2x64xf32>
    %3 = tpu.matmul %1, %2, %cst {dimension_numbers = #tpu.dot_dimension_numbers<[1], [0], [0], [1], [0, 0, 1, 1], [], []>} : vector<2x64xbf16>, vector<64x64xbf16>, vector<2x64xf32> -> vector<2x64xf32>
    %c0_3 = arith.constant 0 : index
    %c0_4 = arith.constant 0 : index
    %4 = vector.load %arg3[%c0_3, %c0_4] : memref<1x64xf32, #tpu.memory_space<vmem>>, vector<1x64xf32>
    %5 = vector.broadcast %4 : vector<1x64xf32> to vector<2x64xf32>
    %6 = arith.addf %3, %5 : vector<2x64xf32>
    %c0_5 = arith.constant 0 : index
    %c0_6 = arith.constant 0 : index
    %7 = vector.load %arg4[%c0_5, %c0_6] : memref<2x64xf32, #tpu.memory_space<vmem>>, vector<2x64xf32>
    tpu.vector_store %arg4[%c0_5, %c0_6], %6 {strides = array<i32>} : memref<2x64xf32, #tpu.memory_space<vmem>>, vector<2x64xf32>,
    return
  }
  func.func @transform_0(%arg0: i32) -> (i32, i32) {
    %c0_i32 = arith.constant 0 : i32
    %c0_i32_0 = arith.constant 0 : i32
    return %arg0, %c0_i32 : i32, i32
  }
  func.func @transform_1(%arg0: i32) -> (i32, i32) {
    %c0_i32 = arith.constant 0 : i32
    %c0_i32_0 = arith.constant 0 : i32
    %c0_i32_1 = arith.constant 0 : i32
    return %c0_i32, %c0_i32_0 : i32, i32
  }
  func.func @transform_2(%arg0: i32) -> (i32, i32) {
    %c0_i32 = arith.constant 0 : i32
    %c0_i32_0 = arith.constant 0 : i32
    %c0_i32_1 = arith.constant 0 : i32
    return %c0_i32, %c0_i32_0 : i32, i32
  }
  func.func @transform_3(%arg0: i32) -> (i32, i32) {
    %c0_i32 = arith.constant 0 : i32
    %c0_i32_0 = arith.constant 0 : i32
    return %arg0, %c0_i32 : i32, i32
  }
}

module attributes {stable_mosaic.version = 11 : i64} {
  func.func @_qp_eq_kernel(%arg0: i32, %arg1: memref<2x64xf32, #tpu.memory_space<vmem>>, %arg2: memref<64x64xbf16, #tpu.memory_space<vmem>>, %arg3: memref<1x64xf32, #tpu.memory_space<vmem>>, %arg4: memref<2x64xf32, #tpu.memory_space<vmem>>) attributes {dimension_semantics = [#tpu.dimension_semantics<parallel>], iteration_bounds = array<i64: 1>, scalar_prefetch = 0 : i64, scratch_operands = 0 : i64, tpu.core_type = #tpu.core_type<tc>, window_params = [{transform_indices = @transform_0, window_bounds = array<i64: 2, 64>}, {pipeline_mode = #tpu.pipeline_mode<synchronous>, transform_indices = @transform_1, window_bounds = array<i64: 64, 64>}, {pipeline_mode = #tpu.pipeline_mode<synchronous>, transform_indices = @transform_2, window_bounds = array<i64: 1, 64>}, {transform_indices = @transform_3, window_bounds = array<i64: 2, 64>}]} {
    %c0 = arith.constant 0 : index
    %c0_0 = arith.constant 0 : index
    %0 = vector.load %arg1[%c0, %c0_0] : memref<2x64xf32, #tpu.memory_space<vmem>>, vector<2x64xf32>
    %1 = arith.truncf %0 : vector<2x64xf32> to vector<2x64xbf16>
    %c0_1 = arith.constant 0 : index
    %c0_2 = arith.constant 0 : index
    %2 = vector.load %arg2[%c0_1, %c0_2] : memref<64x64xbf16, #tpu.memory_space<vmem>>, vector<64x64xbf16>
    %cst = arith.constant dense<0.000000e+00> : vector<2x64xf32>
    %3 = tpu.matmul %1, %2, %cst {dimension_numbers = #tpu.dot_dimension_numbers<[1], [0], [0], [1], [0, 0, 1, 1], [], []>} : vector<2x64xbf16>, vector<64x64xbf16>, vector<2x64xf32> -> vector<2x64xf32>
    %c0_3 = arith.constant 0 : index
    %c0_4 = arith.constant 0 : index
    %4 = vector.load %arg3[%c0_3, %c0_4] : memref<1x64xf32, #tpu.memory_space<vmem>>, vector<1x64xf32>
    %5 = vector.broadcast %4 : vector<1x64xf32> to vector<2x64xf32>
    %6 = arith.addf %3, %5 : vector<2x64xf32>
    %c0_5 = arith.constant 0 : index
    %c0_6 = arith.constant 0 : index
    %7 = vector.load %arg4[%c0_5, %c0_6] : memref<2x64xf32, #tpu.memory_space<vmem>>, vector<2x64xf32>
    tpu.vector_store %arg4[%c0_5, %c0_6], %6 {strides = array<i32>} : memref<2x64xf32, #tpu.memory_space<vmem>>, vector<2x64xf32>,
    return
  }
  func.func @transform_0(%arg0: i32) -> (i32, i32) {
    %c0_i32 = arith.constant 0 : i32
    %c0_i32_0 = arith.constant 0 : i32
    return %arg0, %c0_i32 : i32, i32
  }
  func.func @transform_1(%arg0: i32) -> (i32, i32) {
    %c0_i32 = arith.constant 0 : i32
    %c0_i32_0 = arith.constant 0 : i32
    %c0_i32_1 = arith.constant 0 : i32
    return %c0_i32, %c0_i32_0 : i32, i32
  }
  func.func @transform_2(%arg0: i32) -> (i32, i32) {
    %c0_i32 = arith.constant 0 : i32
    %c0_i32_0 = arith.constant 0 : i32
    %c0_i32_1 = arith.constant 0 : i32
    return %c0_i32, %c0_i32_0 : i32, i32
  }
  func.func @transform_3(%arg0: i32) -> (i32, i32) {
    %c0_i32 = arith.constant 0 : i32
    %c0_i32_0 = arith.constant 0 : i32
    return %arg0, %c0_i32 : i32, i32
  }
}

</mosaic_0001>

<bundles_post_ra>
// kernel: tpu_custom_call.1
= control target key start
LH: loop header
LB: loop body
LE: loop exit
PB: predicated region body
PF: predicated region fallthrough
CT: control target
= control target key end

     0   :  { %8 = vsyncpa [#allocation3], 0  ;;  %s263_s0 = inlined_call_operand.hbm [shape: f32[2,64], index: 0, kind: input, shape index: {}]   ;;  %s264_s1 = inlined_call_operand.hbm [shape: bf16[64,64], index: 1, kind: input, shape index: {}]   ;;  %s265_s2 = inlined_call_operand.vmem [shape: f32[1,64], index: 2, kind: input, shape index: {}]   ;;  %s266_s3 = inlined_call_operand.hbm [shape: f32[2,64], index: 3, kind: output, shape index: {}]  }
   0x1   :  { %9 = vsyncpa [#allocation6], 0 }
   0x2   :  { %10 = vsyncpa [#allocation4], 0  ;;  %s16_s14 = sshll.u32 %s263_s0, 4  ;;  %s226_s15 = smov [#allocation2]   ;;  %s17_s14 = int_to_ptr.hbm [resolvable:$true] %s16_s14 }
   0x3   :  { %s18_s16 = sshll.u32 %s226_s15, 4  ;;  %s26_s19 = sshll.u32 %s264_s1, 4  ;;  %s19_s16 = int_to_ptr.vmem [resolvable:$true] %s18_s16  ;;  %s27_s19 = int_to_ptr.hbm [resolvable:$true] %s26_s19 }
   0x4   :  { %21 = dma.hbm_to_vmem [thread:$0]  %s17_s14, 32, %s19_s16, [#allocation3]  }
   0x5   :  { %s227_s20 = smov [#allocation5]   ;;  %s228_s22 = smov 64  }
   0x6   :  { %s28_s21 = sshll.u32 %s227_s20, 4  ;;  %s229_s23 = smov 4   ;;  %s29_s21 = int_to_ptr.vmem [resolvable:$true] %s28_s21 }
   0x7   :  { %34 = dma.hbm_to_vmem [thread:$0]  %s27_s19, 512, %s29_s21, [#allocation6], %s228_s22, %s228_s22, %s229_s23  }
   0x8   :  { %220 = dma.done.wait [#allocation3], 32  }
   0x9   :  { %221 = vsyncadd [#allocation3], 4294967264 }
   0xa   :  { %222 = dma.done.wait [#allocation6], 512  }
   0xb   :  { %223 = vsyncadd [#allocation6], 4294966784  ;;  %v141_v0 = vld [vmem:[#allocation5 + $0x18] sm:$0xff]  ;;  %v140_v1 = vld [vmem:[#allocation5 + $0x10] sm:$0xff]  ;;  %vm84_vm0 = vcmask 523264   ;;  %s230_s24 = smov [#allocation7]  }
   0xc   :  { %92 = vmatpush.bf16.msra.mxu0 %v141_v0  ;;  %v139_v2 = vld [vmem:[#allocation5 + $0x8] sm:$0xff]  ;;  %v138_v3 = vld [vmem:[#allocation5] sm:$0xff]  ;;  %v46_v4 = vld [vmem:[#allocation2] sm:$0x3]  ;;  %s108_s25 = sshll.u32 %s230_s24, 4  ;;  %s110_s28 = sshll.u32 %s266_s3, 4  ;;  %s109_s25 = int_to_ptr.vmem [resolvable:$true] %s108_s25  ;;  %s111_s28 = int_to_ptr.hbm [resolvable:$true] %s110_s28 }
   0xd   :  { %v47_v5 = vpack.c.bf16 %v46_v4, %v46_v4  ;;  %v147_v6 = vld [vmem:[%s265_s2] ss:$0 sm:$0xff]  ;;  %vm101_vm1 = vcmask 517120  }
  0x10   :  { %93 = vmatpush.bf16.msra.mxu0 %v140_v1 }
  0x14   :  { %94 = vmatpush.bf16.msra.mxu0 %v139_v2 }
  0x18   :  { %95 = vmatpush.bf16.msra.mxu0 %v138_v3 }
  0x1b   :  { %137 = vmatmul.msk.bf16.vlgmr.msra.gmra.mxu0 %vm84_vm0, %v47_v5 }
  0x98   :  { %v97_v7 = vpop.f32.mrf.mxu0 }
  0x99   :  { %v98_v8 = vadd.f32 %v147_v6, %v97_v7 }
  0x9b   :  { %102 = vst.msk [vmem:[#allocation7] sm:$0x3] %vm101_vm1, %v98_v8 }
  0x9c   :  { %113 = dma.vmem_to_hbm [thread:$0]  %s109_s25, 32, %s111_s28, [#allocation4]  }
  0xa0   :  { %v99_v9 = vpop.f32.mrf.mxu0 }
  0xa1   :  { %224 = dma.done.wait [#allocation4], 32  }
  0xa2   :  { %225 = vsyncadd [#allocation4], 4294967264 }
  0xa3   :  { %118 = vsyncpa [#allocation3], 1 }
  0xa4   :  { %119 = vsyncpa [#allocation6], 1 }
  0xa5   :  { %120 = vsyncpa [#allocation4], 1 }

// kernel: tpu_custom_call.1
= control target key start
LH: loop header
LB: loop body
LE: loop exit
PB: predicated region body
PF: predicated region fallthrough
CT: control target
= control target key end

     0   :  { %8 = vsyncpa [#allocation3], 0  ;;  %s263_s0 = inlined_call_operand.hbm [shape: f32[2,64], index: 0, kind: input, shape index: {}]   ;;  %s264_s1 = inlined_call_operand.hbm [shape: bf16[64,64], index: 1, kind: input, shape index: {}]   ;;  %s265_s2 = inlined_call_operand.vmem [shape: f32[1,64], index: 2, kind: input, shape index: {}]   ;;  %s266_s3 = inlined_call_operand.hbm [shape: f32[2,64], index: 3, kind: output, shape index: {}]  }
   0x1   :  { %9 = vsyncpa [#allocation6], 0 }
   0x2   :  { %10 = vsyncpa [#allocation4], 0  ;;  %s16_s14 = sshll.u32 %s263_s0, 4  ;;  %s226_s15 = smov [#allocation2]   ;;  %s17_s14 = int_to_ptr.hbm [resolvable:$true] %s16_s14 }
   0x3   :  { %s18_s16 = sshll.u32 %s226_s15, 4  ;;  %s26_s19 = sshll.u32 %s264_s1, 4  ;;  %s19_s16 = int_to_ptr.vmem [resolvable:$true] %s18_s16  ;;  %s27_s19 = int_to_ptr.hbm [resolvable:$true] %s26_s19 }
   0x4   :  { %21 = dma.hbm_to_vmem [thread:$0]  %s17_s14, 32, %s19_s16, [#allocation3]  }
   0x5   :  { %s227_s20 = smov [#allocation5]   ;;  %s228_s22 = smov 64  }
   0x6   :  { %s28_s21 = sshll.u32 %s227_s20, 4  ;;  %s229_s23 = smov 4   ;;  %s29_s21 = int_to_ptr.vmem [resolvable:$true] %s28_s21 }
   0x7   :  { %34 = dma.hbm_to_vmem [thread:$0]  %s27_s19, 512, %s29_s21, [#allocation6], %s228_s22, %s228_s22, %s229_s23  }
   0x8   :  { %220 = dma.done.wait [#allocation3], 32  }
   0x9   :  { %221 = vsyncadd [#allocation3], 4294967264 }
   0xa   :  { %222 = dma.done.wait [#allocation6], 512  }
   0xb   :  { %223 = vsyncadd [#allocation6], 4294966784  ;;  %v141_v0 = vld [vmem:[#allocation5 + $0x18] sm:$0xff]  ;;  %v140_v1 = vld [vmem:[#allocation5 + $0x10] sm:$0xff]  ;;  %vm84_vm0 = vcmask 523264   ;;  %s230_s24 = smov [#allocation7]  }
   0xc   :  { %92 = vmatpush.bf16.msra.mxu0 %v141_v0  ;;  %v139_v2 = vld [vmem:[#allocation5 + $0x8] sm:$0xff]  ;;  %v138_v3 = vld [vmem:[#allocation5] sm:$0xff]  ;;  %v46_v4 = vld [vmem:[#allocation2] sm:$0x3]  ;;  %s108_s25 = sshll.u32 %s230_s24, 4  ;;  %s110_s28 = sshll.u32 %s266_s3, 4  ;;  %s109_s25 = int_to_ptr.vmem [resolvable:$true] %s108_s25  ;;  %s111_s28 = int_to_ptr.hbm [resolvable:$true] %s110_s28 }
   0xd   :  { %v47_v5 = vpack.c.bf16 %v46_v4, %v46_v4  ;;  %v147_v6 = vld [vmem:[%s265_s2] ss:$0 sm:$0xff]  ;;  %vm101_vm1 = vcmask 517120  }
  0x10   :  { %93 = vmatpush.bf16.msra.mxu0 %v140_v1 }
  0x14   :  { %94 = vmatpush.bf16.msra.mxu0 %v139_v2 }
  0x18   :  { %95 = vmatpush.bf16.msra.mxu0 %v138_v3 }
  0x1b   :  { %137 = vmatmul.msk.bf16.vlgmr.msra.gmra.mxu0 %vm84_vm0, %v47_v5 }
  0x98   :  { %v97_v7 = vpop.f32.mrf.mxu0 }
  0x99   :  { %v98_v8 = vadd.f32 %v147_v6, %v97_v7 }
  0x9b   :  { %102 = vst.msk [vmem:[#allocation7] sm:$0x3] %vm101_vm1, %v98_v8 }
  0x9c   :  { %113 = dma.vmem_to_hbm [thread:$0]  %s109_s25, 32, %s111_s28, [#allocation4]  }
  0xa0   :  { %v99_v9 = vpop.f32.mrf.mxu0 }
  0xa1   :  { %224 = dma.done.wait [#allocation4], 32  }
  0xa2   :  { %225 = vsyncadd [#allocation4], 4294967264 }
  0xa3   :  { %118 = vsyncpa [#allocation3], 1 }
  0xa4   :  { %119 = vsyncpa [#allocation6], 1 }
  0xa5   :  { %120 = vsyncpa [#allocation4], 1 }

</bundles_post_ra>
